<compile_context>
chip_gen: v7x
topology: tpu7x:2x2x1
jax: 0.10.0
libtpu: 0.0.40
codegen_flags: <defaults>
</compile_context>

<pallas_src>
import numpy as np
import jax
import jax.numpy as jnp
from jax.experimental import pallas as pl
from jax.experimental.pallas import tpu as pltpu

BN_EPS = 1e-5


# ----------------------------------------------------------------------------- kernels
def _conv3_batched(groups):
    """Conv1d(kernel=3, padding=1, bias=False) summed over channel groups.

    groups: list of (x, w) with
        x: (TB, Cg, L) f32 activations, L on the lane axis
        w: (3, Cout, Cg) f32 weights, w[t, o, i] == torch_w[o, i, t]
    Returns (TB, Cout, L) f32.

    Shift taps are built with pltpu.roll (XLU) + a lane mask (VPU) - no lane-axis
    concatenation copies - and each tap/group is one batched MXU matmul with f32 acc.
    """
    x0, w0 = groups[0]
    TB, _, L = x0.shape
    Cout = w0.shape[1]
    acc = jnp.zeros((TB, Cout, L), jnp.float32)
    for x, w in groups:
        Cg = x.shape[1]
        lane = jax.lax.broadcasted_iota(jnp.int32, (TB, Cg, L), 2)
        zeros = jnp.zeros_like(x)
        xm1 = jnp.where(lane == 0, zeros, pltpu.roll(x, 1, axis=2))          # x[..., l-1]
        xp1 = jnp.where(lane == L - 1, zeros, pltpu.roll(x, L - 1, axis=2))  # x[..., l+1]
        for t, xt in enumerate((xm1, x, xp1)):
            wt = jnp.broadcast_to(w[t], (TB, Cout, Cg))
            acc = acc + jnp.einsum('bok,bkl->bol', wt, xt,
                                   preferred_element_type=jnp.float32)
    return acc


def _up_conv1_kernel(x2_ref, x1u_ref, wa_ref, wb_ref, y1_ref, st1_ref):
    """conv1 on the (virtual) cat([x2, x1_upsampled]); emits bf16 activations + BN1 stats."""
    x2 = x2_ref[...].astype(jnp.float32)     # (TB, C2, L)
    x1 = x1u_ref[...].astype(jnp.float32)    # (TB, C1, L) - already upsampled+padded+lerped
    acc = _conv3_batched([(x2, wa_ref[...]), (x1, wb_ref[...])])   # (TB, Cmid, L) f32
    y1_ref[...] = acc.astype(y1_ref.dtype)
    s = jnp.sum(acc, axis=2, keepdims=True)                         # (TB, Cmid, 1)
    ss = jnp.sum(acc * acc, axis=2, keepdims=True)
    st1_ref[...] = jnp.concatenate([s, ss], axis=1)                 # (TB, 2*Cmid, 1)


def _bn_relu_conv2_kernel(y1_ref, sc1_ref, sh1_ref, wg_ref, y2_ref, st2_ref):
    """BN1 (fused per-channel scale/shift) + ReLU + conv2; emits bf16 acts + BN2 stats."""
    h = jnp.maximum(y1_ref[...].astype(jnp.float32) * sc1_ref[...] + sh1_ref[...], 0.0)
    acc = _conv3_batched([(h, wg_ref[...])])                        # (TB, Cout, L) f32
    y2_ref[...] = acc.astype(y2_ref.dtype)
    s = jnp.sum(acc, axis=2, keepdims=True)
    ss = jnp.sum(acc * acc, axis=2, keepdims=True)
    st2_ref[...] = jnp.concatenate([s, ss], axis=1)                 # (TB, 2*Cout, 1)


# ----------------------------------------------------------------------------- wrapper
def _upsample_pad_coeffs(L_in, scale, L_out):
    """Static gather indices + lerp weights for Upsample(linear, align_corners=True)
    followed by F.pad(.., [diff//2, diff - diff//2]) (zero pad; crops if diff < 0)."""
    L_up = int(np.floor(L_in * scale))
    o = np.arange(L_up, dtype=np.float64)
    if L_up > 1 and L_in > 1:
        src = o * (L_in - 1) / (L_up - 1)
    else:
        src = np.zeros(L_up, dtype=np.float64)
    f = np.clip(np.floor(src).astype(np.int64), 0, L_in - 1)
    c = np.clip(f + 1, 0, L_in - 1)
    frac = (src - f).astype(np.float32)

    lo = (L_out - L_up) // 2
    q = np.arange(L_out, dtype=np.int64) - lo
    valid = (q >= 0) & (q < L_up)
    qc = np.clip(q, 0, L_up - 1)
    idx_f = np.where(valid, f[qc], 0).astype(np.int32)
    idx_c = np.where(valid, c[qc], 0).astype(np.int32)
    w_hi = np.where(valid, frac[qc], 0.0).astype(np.float32)
    w_lo = np.where(valid, 1.0 - frac[qc], 0.0).astype(np.float32)
    return (jnp.asarray(idx_f), jnp.asarray(idx_c),
            jnp.asarray(w_lo.reshape(1, L_out)), jnp.asarray(w_hi.reshape(1, L_out)))


def _choose_tb(B, bytes_per_batch, target_bytes=1 << 20, min_steps=2):
    """Largest TB dividing B with >= min_steps grid steps (when possible) and a block
    size not far past ~target_bytes, so DMAs are big but both v7x cores stay busy."""
    best = 1
    for tb in range(1, B + 1):
        if B % tb:
            continue
        steps = B // tb
        if B >= min_steps and steps < min_steps:
            continue
        if tb == 1 or tb * bytes_per_batch <= target_bytes:
            best = max(best, tb)
    return best


def _cparams(block_bytes):
    # Double-buffered pipeline blocks + in-kernel temporaries, capped at 48 MiB so we
    # never claim all of v7x's 64 MiB physical VMEM (compiler needs headroom).
    limit = int(min(max(6 * block_bytes + (8 << 20), 32 << 20), 48 << 20))
    return pltpu.CompilerParams(dimension_semantics=("parallel",),
                                vmem_limit_bytes=limit)


def up_forward(params, x1, x2, scale_factor=2):
    """x1: (B, C1, L1), x2: (B, C2, L2) in PyTorch NCL layout; returns (B, C_out, L2) f32."""
    w1, g1, b1, w2, g2, b2 = params           # w1:(Cmid,Cin,3) w2:(Cout,Cmid,3), torch layout
    B, C1, L1 = x1.shape
    _, C2, L2 = x2.shape
    Cin = C1 + C2
    Cmid = w1.shape[0]
    Cout = w2.shape[0]
    f32, bf16 = jnp.float32, jnp.bfloat16

    # Upsample(linear, align_corners=True) + pad folded into a gather + lerp, done once in
    # the wrapper as a single fused XLA pass; written once as bf16 (halved HBM traffic).
    idx_f, idx_c, w_lo, w_hi = _upsample_pad_coeffs(L1, scale_factor, L2)
    x1u = (jnp.take(x1, idx_f, axis=2) * w_lo +
           jnp.take(x1, idx_c, axis=2) * w_hi).astype(bf16)        # (B, C1, L2)

    # Split / repack conv-1 weight by channel group of cat([x2, x1]) so the kernel never
    # materializes the concatenated activation. Layout (3, Cout, Cg): w[t, o, i] = torch[o, i, t].
    w1a = jnp.transpose(w1[:, :C2, :], (2, 0, 1)).astype(f32)      # x2 group
    w1b = jnp.transpose(w1[:, C2:, :], (2, 0, 1)).astype(f32)      # x1 group
    w2g = jnp.transpose(w2, (2, 0, 1)).astype(f32)

    TB = _choose_tb(B, 4 * max(Cin, Cmid, Cout) * L2)
    nb = B // TB

    # ---- kernel 1: conv1 on (x2, upsampled x1) + per-block BN1 partial stats
    bpb1 = TB * L2 * (4 * C2 + 2 * C1 + 2 * Cmid) + 4 * TB * L2 * (3 * Cin + Cmid)
    y1, st1 = pl.pallas_call(
        _up_conv1_kernel,
        grid=(nb,),
        in_specs=[
            pl.BlockSpec((TB, C2, L2), lambda b: (b, 0, 0)),
            pl.BlockSpec((TB, C1, L2), lambda b: (b, 0, 0)),
            pl.BlockSpec((3, Cmid, C2), lambda b: (0, 0, 0)),
            pl.BlockSpec((3, Cmid, C1), lambda b: (0, 0, 0)),
        ],
        out_specs=(
            pl.BlockSpec((TB, Cmid, L2), lambda b: (b, 0, 0)),
            pl.BlockSpec((TB, 2 * Cmid, 1), lambda b: (b, 0, 0)),
        ),
        out_shape=(
            jax.ShapeDtypeStruct((B, Cmid, L2), bf16),
            jax.ShapeDtypeStruct((B, 2 * Cmid, 1), f32),
        ),
        compiler_params=_cparams(bpb1),
    )(x2, x1u, w1a, w1b)

    # BN1 (training mode, biased stats over (B, L)) fused into per-channel scale/shift.
    n = float(B * L2)
    mean1 = jnp.sum(st1[:, :Cmid, :], axis=0) / n                  # (Cmid, 1)
    var1 = jnp.sum(st1[:, Cmid:, :], axis=0) / n - mean1 * mean1
    sc1 = g1.reshape(-1, 1) * jax.lax.rsqrt(var1 + BN_EPS)
    sh1 = b1.reshape(-1, 1) - mean1 * sc1

    # ---- kernel 2: BN1 + ReLU + conv2 + per-block BN2 partial stats
    bpb2 = TB * L2 * (2 * Cmid + 2 * Cout) + 4 * TB * L2 * (4 * Cmid + Cout)
    y2, st2 = pl.pallas_call(
        _bn_relu_conv2_kernel,
        grid=(nb,),
        in_specs=[
            pl.BlockSpec((TB, Cmid, L2), lambda b: (b, 0, 0)),
            pl.BlockSpec((Cmid, 1), lambda b: (0, 0)),
            pl.BlockSpec((Cmid, 1), lambda b: (0, 0)),
            pl.BlockSpec((3, Cout, Cmid), lambda b: (0, 0, 0)),
        ],
        out_specs=(
            pl.BlockSpec((TB, Cout, L2), lambda b: (b, 0, 0)),
            pl.BlockSpec((TB, 2 * Cout, 1), lambda b: (b, 0, 0)),
        ),
        out_shape=(
            jax.ShapeDtypeStruct((B, Cout, L2), bf16),
            jax.ShapeDtypeStruct((B, 2 * Cout, 1), f32),
        ),
        compiler_params=_cparams(bpb2),
    )(y1, sc1, sh1, w2g)

    mean2 = jnp.sum(st2[:, :Cout, :], axis=0) / n
    var2 = jnp.sum(st2[:, Cout:, :], axis=0) / n - mean2 * mean2
    sc2 = g2.reshape(-1, 1) * jax.lax.rsqrt(var2 + BN_EPS)
    sh2 = b2.reshape(-1, 1) - mean2 * sc2

    # Final BN2 scale/shift + ReLU as plain jnp (XLA fuses it with the tiny stats
    # reduction / downstream consumer) -> no third pallas_call, no extra y2 round trip.
    out = jnp.maximum(y2.astype(f32) * sc2[None, :, :] + sh2[None, :, :], 0.0)
    return out


# ----------------------------------------------------------------------------- reference
def _upsample_pad_matrix(L_in, scale, L_target):
    """Dense (L_target, L_in) operator == Upsample(linear, align_corners=True) + F.pad.
    Reference-only."""
    L_out = int(np.floor(L_in * scale))
    src = np.arange(L_out, dtype=np.float64)
    if L_out > 1 and L_in > 1:
        src = src * (L_in - 1) / (L_out - 1)
    else:
        src[:] = 0.0
    f = np.clip(np.floor(src).astype(np.int64), 0, L_in - 1)
    c = np.clip(f + 1, 0, L_in - 1)
    frac = (src - f).astype(np.float32)
    M = np.zeros((L_out, L_in), dtype=np.float32)
    M[np.arange(L_out), f] += 1.0 - frac
    M[np.arange(L_out), c] += frac
    U = np.zeros((L_target, L_in), dtype=np.float32)
    lo = (L_target - L_out) // 2
    U[lo:lo + L_out, :] = M
    return jnp.asarray(U)


def up_forward_ref(params, x1, x2, scale_factor=2):
    """Pure-JAX f32 reference (NCL layout, lax conv) for validation."""
    w1, g1, b1, w2, g2, b2 = params
    L2 = x2.shape[2]
    U = _upsample_pad_matrix(x1.shape[2], scale_factor, L2)
    x1u = jnp.einsum('ol,bcl->bco', U, x1)
    x = jnp.concatenate([x2, x1u], axis=1)

    def conv_bn_relu(xin, w, g, b):
        y = jax.lax.conv_general_dilated(
            xin, w, window_strides=(1,), padding=((1, 1),),
            dimension_numbers=('NCH', 'OIH', 'NCH'))
        mean = jnp.mean(y, axis=(0, 2), keepdims=True)
        var = jnp.mean((y - mean) ** 2, axis=(0, 2), keepdims=True)
        yn = (y - mean) / jnp.sqrt(var + BN_EPS)
        yn = yn * g.reshape(1, -1, 1) + b.reshape(1, -1, 1)
        return jnp.maximum(yn, 0.0)

    h = conv_bn_relu(x, w1, g1, b1)
    return conv_bn_relu(h, w2, g2, b2)


# ----------------------------------------------------------------------------- demo
if __name__ == "__main__":
    key = jax.random.PRNGKey(0)
    in_channels, out_channels = 16, 8
    mid_channels = in_channels // 2            # DoubleConv mid = in_channels // 2 (bilinear path)
    B, L1 = 2, 64
    C1 = C2 = in_channels // 2                 # cat([x2, x1], dim=1) -> in_channels
    L2 = 2 * L1                                # 128 (lane-dense)

    kx1, kx2, kw1, kw2, kg1, kb1, kg2, kb2 = jax.random.split(key, 8)
    x1 = jax.random.normal(kx1, (B, C1, L1), jnp.float32)
    x2 = jax.random.normal(kx2, (B, C2, L2), jnp.float32)

    # Conv1d weights in PyTorch (out, in, k) layout, bias=False.
    w1 = jax.random.normal(kw1, (mid_channels, in_channels, 3), jnp.float32) / np.sqrt(3 * in_channels)
    w2 = jax.random.normal(kw2, (out_channels, mid_channels, 3), jnp.float32) / np.sqrt(3 * mid_channels)
    # BatchNorm1d affine params (non-trivial values to exercise the scale/shift path).
    g1 = 1.0 + 0.1 * jax.random.normal(kg1, (mid_channels,), jnp.float32)
    b1 = 0.1 * jax.random.normal(kb1, (mid_channels,), jnp.float32)
    g2 = 1.0 + 0.1 * jax.random.normal(kg2, (out_channels,), jnp.float32)
    b2 = 0.1 * jax.random.normal(kb2, (out_channels,), jnp.float32)
    params = (w1, g1, b1, w2, g2, b2)

    out = jax.block_until_ready(up_forward(params, x1, x2))
    ref = up_forward_ref(params, x1, x2)

    assert out.shape == (B, out_channels, L2), out.shape
    # bf16 HBM intermediates (x1u / y1 / y2) -> tolerance loosened vs. pure-f32 path.
    np.testing.assert_allclose(np.asarray(out), np.asarray(ref), rtol=2e-2, atol=2e-2)
    print("KERNEL_OK")
</pallas_src>

<mosaic_0001>
module attributes {stable_mosaic.version = 11 : i64} {
  func.func @_up_conv1_kernel(%arg0: i32, %arg1: memref<1x8x128xf32, #tpu.memory_space<vmem>>, %arg2: memref<1x8x128xbf16, #tpu.memory_space<vmem>>, %arg3: memref<3x8x8xf32, #tpu.memory_space<vmem>>, %arg4: memref<3x8x8xf32, #tpu.memory_space<vmem>>, %arg5: memref<1x8x128xbf16, #tpu.memory_space<vmem>>, %arg6: memref<1x16x1xf32, #tpu.memory_space<vmem>>) attributes {dimension_semantics = [#tpu.dimension_semantics<parallel>], iteration_bounds = array<i64: 2>, scalar_prefetch = 0 : i64, scratch_operands = 0 : i64, tpu.core_type = #tpu.core_type<tc>, window_params = [{transform_indices = @transform_0, window_bounds = array<i64: 1, 8, 128>}, {transform_indices = @transform_1, window_bounds = array<i64: 1, 8, 128>}, {pipeline_mode = #tpu.pipeline_mode<synchronous>, transform_indices = @transform_2, window_bounds = array<i64: 3, 8, 8>}, {pipeline_mode = #tpu.pipeline_mode<synchronous>, transform_indices = @transform_3, window_bounds = array<i64: 3, 8, 8>}, {transform_indices = @transform_4, window_bounds = array<i64: 1, 8, 128>}, {transform_indices = @transform_5, window_bounds = array<i64: 1, 16, 1>}]} {
    %c0 = arith.constant 0 : index
    %c0_0 = arith.constant 0 : index
    %c0_1 = arith.constant 0 : index
    %0 = vector.load %arg1[%c0, %c0_0, %c0_1] : memref<1x8x128xf32, #tpu.memory_space<vmem>>, vector<1x8x128xf32>
    %c0_2 = arith.constant 0 : index
    %c0_3 = arith.constant 0 : index
    %c0_4 = arith.constant 0 : index
    %1 = vector.load %arg2[%c0_2, %c0_3, %c0_4] : memref<1x8x128xbf16, #tpu.memory_space<vmem>>, vector<1x8x128xbf16>
    %2 = arith.extf %1 : vector<1x8x128xbf16> to vector<1x8x128xf32>
    %c0_5 = arith.constant 0 : index
    %c0_6 = arith.constant 0 : index
    %c0_7 = arith.constant 0 : index
    %3 = vector.load %arg3[%c0_5, %c0_6, %c0_7] : memref<3x8x8xf32, #tpu.memory_space<vmem>>, vector<3x8x8xf32>
    %c0_8 = arith.constant 0 : index
    %c0_9 = arith.constant 0 : index
    %c0_10 = arith.constant 0 : index
    %4 = vector.load %arg4[%c0_8, %c0_9, %c0_10] : memref<3x8x8xf32, #tpu.memory_space<vmem>>, vector<3x8x8xf32>
    %cst = arith.constant 0.000000e+00 : f32
    %5 = vector.broadcast %cst : f32 to vector<1x8x128xf32>
    %6 = tpu.iota {dimensions = array<i32: 2>} : vector<1x8x128xi32>
    %cst_11 = arith.constant 0.000000e+00 : f32
    %7 = vector.broadcast %cst_11 : f32 to vector<1x8x128xf32>
    %c0_i32 = arith.constant 0 : i32
    %8 = vector.broadcast %c0_i32 : i32 to vector<1x8x128xi32>
    %9 = arith.cmpi eq, %6, %8 : vector<1x8x128xi32>
    %c1_i32 = arith.constant 1 : i32
    %10 = tpu.dynamic_rotate %0 by %c1_i32 dim 2 : vector<1x8x128xf32>, i32 -> vector<1x8x128xf32>
    %11 = arith.select %9, %7, %10 : vector<1x8x128xi1>, vector<1x8x128xf32>
    %c127_i32 = arith.constant 127 : i32
    %12 = vector.broadcast %c127_i32 : i32 to vector<1x8x128xi32>
    %13 = arith.cmpi eq, %6, %12 : vector<1x8x128xi32>
    %c127_i32_12 = arith.constant 127 : i32
    %14 = tpu.dynamic_rotate %0 by %c127_i32_12 dim 2 : vector<1x8x128xf32>, i32 -> vector<1x8x128xf32>
    %15 = arith.select %13, %7, %14 : vector<1x8x128xi1>, vector<1x8x128xf32>
    %16 = vector.extract_strided_slice %3 {offsets = [0, 0, 0], sizes = [1, 8, 8], strides = [1, 1, 1]} : vector<3x8x8xf32> to vector<1x8x8xf32>
    %17 = vector.shape_cast %16 : vector<1x8x8xf32> to vector<8x8xf32>
    %18 = vector.shape_cast %17 : vector<8x8xf32> to vector<1x8x8xf32>
    "tpu.trace_start"() <{level = 10 : i32, message = "bok,bkl->bol"}> : () -> ()
    %cst_13 = arith.constant dense<0.000000e+00> : vector<1x8x128xf32>
    %19 = tpu.matmul %18, %11, %cst_13 {dimension_numbers = #tpu.dot_dimension_numbers<[2], [1], [1], [2], [0, 0, 0, 1, 1, 2], [0], [0]>} : vector<1x8x8xf32>, vector<1x8x128xf32>, vector<1x8x128xf32> -> vector<1x8x128xf32>
    "tpu.trace_stop"() : () -> ()
    %20 = arith.addf %5, %19 : vector<1x8x128xf32>
    %21 = vector.extract_strided_slice %3 {offsets = [1, 0, 0], sizes = [1, 8, 8], strides = [1, 1, 1]} : vector<3x8x8xf32> to vector<1x8x8xf32>
    %22 = vector.shape_cast %21 : vector<1x8x8xf32> to vector<8x8xf32>
    %23 = vector.shape_cast %22 : vector<8x8xf32> to vector<1x8x8xf32>
    "tpu.trace_start"() <{level = 10 : i32, message = "bok,bkl->bol"}> : () -> ()
    %cst_14 = arith.constant dense<0.000000e+00> : vector<1x8x128xf32>
    %24 = tpu.matmul %23, %0, %cst_14 {dimension_numbers = #tpu.dot_dimension_numbers<[2], [1], [1], [2], [0, 0, 0, 1, 1, 2], [0], [0]>} : vector<1x8x8xf32>, vector<1x8x128xf32>, vector<1x8x128xf32> -> vector<1x8x128xf32>
    "tpu.trace_stop"() : () -> ()
    %25 = arith.addf %20, %24 : vector<1x8x128xf32>
    %26 = vector.extract_strided_slice %3 {offsets = [2, 0, 0], sizes = [1, 8, 8], strides = [1, 1, 1]} : vector<3x8x8xf32> to vector<1x8x8xf32>
    %27 = vector.shape_cast %26 : vector<1x8x8xf32> to vector<8x8xf32>
    %28 = vector.shape_cast %27 : vector<8x8xf32> to vector<1x8x8xf32>
    "tpu.trace_start"() <{level = 10 : i32, message = "bok,bkl->bol"}> : () -> ()
    %cst_15 = arith.constant dense<0.000000e+00> : vector<1x8x128xf32>
    %29 = tpu.matmul %28, %15, %cst_15 {dimension_numbers = #tpu.dot_dimension_numbers<[2], [1], [1], [2], [0, 0, 0, 1, 1, 2], [0], [0]>} : vector<1x8x8xf32>, vector<1x8x128xf32>, vector<1x8x128xf32> -> vector<1x8x128xf32>
    "tpu.trace_stop"() : () -> ()
    %30 = arith.addf %25, %29 : vector<1x8x128xf32>
    %31 = tpu.iota {dimensions = array<i32: 2>} : vector<1x8x128xi32>
    %cst_16 = arith.constant 0.000000e+00 : f32
    %32 = vector.broadcast %cst_16 : f32 to vector<1x8x128xf32>
    %c0_i32_17 = arith.constant 0 : i32
    %33 = vector.broadcast %c0_i32_17 : i32 to vector<1x8x128xi32>
    %34 = arith.cmpi eq, %31, %33 : vector<1x8x128xi32>
    %c1_i32_18 = arith.constant 1 : i32
    %35 = tpu.dynamic_rotate %2 by %c1_i32_18 dim 2 : vector<1x8x128xf32>, i32 -> vector<1x8x128xf32>
    %36 = arith.select %34, %32, %35 : vector<1x8x128xi1>, vector<1x8x128xf32>
    %c127_i32_19 = arith.constant 127 : i32
    %37 = vector.broadcast %c127_i32_19 : i32 to vector<1x8x128xi32>
    %38 = arith.cmpi eq, %31, %37 : vector<1x8x128xi32>
    %c127_i32_20 = arith.constant 127 : i32
    %39 = tpu.dynamic_rotate %2 by %c127_i32_20 dim 2 : vector<1x8x128xf32>, i32 -> vector<1x8x128xf32>
    %40 = arith.select %38, %32, %39 : vector<1x8x128xi1>, vector<1x8x128xf32>
    %41 = vector.extract_strided_slice %4 {offsets = [0, 0, 0], sizes = [1, 8, 8], strides = [1, 1, 1]} : vector<3x8x8xf32> to vector<1x8x8xf32>
    %42 = vector.shape_cast %41 : vector<1x8x8xf32> to vector<8x8xf32>
    %43 = vector.shape_cast %42 : vector<8x8xf32> to vector<1x8x8xf32>
    "tpu.trace_start"() <{level = 10 : i32, message = "bok,bkl->bol"}> : () -> ()
    %cst_21 = arith.constant dense<0.000000e+00> : vector<1x8x128xf32>
    %44 = tpu.matmul %43, %36, %cst_21 {dimension_numbers = #tpu.dot_dimension_numbers<[2], [1], [1], [2], [0, 0, 0, 1, 1, 2], [0], [0]>} : vector<1x8x8xf32>, vector<1x8x128xf32>, vector<1x8x128xf32> -> vector<1x8x128xf32>
    "tpu.trace_stop"() : () -> ()
    %45 = arith.addf %30, %44 : vector<1x8x128xf32>
    %46 = vector.extract_strided_slice %4 {offsets = [1, 0, 0], sizes = [1, 8, 8], strides = [1, 1, 1]} : vector<3x8x8xf32> to vector<1x8x8xf32>
    %47 = vector.shape_cast %46 : vector<1x8x8xf32> to vector<8x8xf32>
    %48 = vector.shape_cast %47 : vector<8x8xf32> to vector<1x8x8xf32>
    "tpu.trace_start"() <{level = 10 : i32, message = "bok,bkl->bol"}> : () -> ()
    %cst_22 = arith.constant dense<0.000000e+00> : vector<1x8x128xf32>
    %49 = tpu.matmul %48, %2, %cst_22 {dimension_numbers = #tpu.dot_dimension_numbers<[2], [1], [1], [2], [0, 0, 0, 1, 1, 2], [0], [0]>} : vector<1x8x8xf32>, vector<1x8x128xf32>, vector<1x8x128xf32> -> vector<1x8x128xf32>
    "tpu.trace_stop"() : () -> ()
    %50 = arith.addf %45, %49 : vector<1x8x128xf32>
    %51 = vector.extract_strided_slice %4 {offsets = [2, 0, 0], sizes = [1, 8, 8], strides = [1, 1, 1]} : vector<3x8x8xf32> to vector<1x8x8xf32>
    %52 = vector.shape_cast %51 : vector<1x8x8xf32> to vector<8x8xf32>
    %53 = vector.shape_cast %52 : vector<8x8xf32> to vector<1x8x8xf32>
    "tpu.trace_start"() <{level = 10 : i32, message = "bok,bkl->bol"}> : () -> ()
    %cst_23 = arith.constant dense<0.000000e+00> : vector<1x8x128xf32>
    %54 = tpu.matmul %53, %40, %cst_23 {dimension_numbers = #tpu.dot_dimension_numbers<[2], [1], [1], [2], [0, 0, 0, 1, 1, 2], [0], [0]>} : vector<1x8x8xf32>, vector<1x8x128xf32>, vector<1x8x128xf32> -> vector<1x8x128xf32>
    "tpu.trace_stop"() : () -> ()
    %55 = arith.addf %50, %54 : vector<1x8x128xf32>
    %56 = arith.truncf %55 : vector<1x8x128xf32> to vector<1x8x128xbf16>
    %c0_24 = arith.constant 0 : index
    %c0_25 = arith.constant 0 : index
    %c0_26 = arith.constant 0 : index
    %57 = vector.load %arg5[%c0_24, %c0_25, %c0_26] : memref<1x8x128xbf16, #tpu.memory_space<vmem>>, vector<1x8x128xbf16>
    tpu.vector_store %arg5[%c0_24, %c0_25, %c0_26], %56 {strides = array<i32>} : memref<1x8x128xbf16, #tpu.memory_space<vmem>>, vector<1x8x128xbf16>,
    %cst_27 = arith.constant dense<0.000000e+00> : vector<1x8xf32>
    %58 = vector.multi_reduction <add>, %55, %cst_27 [2] : vector<1x8x128xf32> to vector<1x8xf32>
    %59 = vector.shape_cast %58 : vector<1x8xf32> to vector<1x8x1xf32>
    %60 = arith.mulf %55, %55 : vector<1x8x128xf32>
    %cst_28 = arith.constant dense<0.000000e+00> : vector<1x8xf32>
    %61 = vector.multi_reduction <add>, %60, %cst_28 [2] : vector<1x8x128xf32> to vector<1x8xf32>
    %62 = vector.shape_cast %61 : vector<1x8xf32> to vector<1x8x1xf32>
    %63 = tpu.concatenate %59, %62 in 1 : vector<1x8x1xf32>, vector<1x8x1xf32> -> vector<1x16x1xf32>
    %c0_29 = arith.constant 0 : index
    %c0_30 = arith.constant 0 : index
    %c0_31 = arith.constant 0 : index
    %64 = vector.load %arg6[%c0_29, %c0_30, %c0_31] : memref<1x16x1xf32, #tpu.memory_space<vmem>>, vector<1x16x1xf32>
    tpu.vector_store %arg6[%c0_29, %c0_30, %c0_31], %63 {strides = array<i32>} : memref<1x16x1xf32, #tpu.memory_space<vmem>>, vector<1x16x1xf32>,
    return
  }
  func.func @transform_0(%arg0: i32) -> (i32, i32, i32) {
    %c0_i32 = arith.constant 0 : i32
    %c0_i32_0 = arith.constant 0 : i32
    %c0_i32_1 = arith.constant 0 : i32
    return %arg0, %c0_i32, %c0_i32_0 : i32, i32, i32
  }
  func.func @transform_1(%arg0: i32) -> (i32, i32, i32) {
    %c0_i32 = arith.constant 0 : i32
    %c0_i32_0 = arith.constant 0 : i32
    %c0_i32_1 = arith.constant 0 : i32
    return %arg0, %c0_i32, %c0_i32_0 : i32, i32, i32
  }
  func.func @transform_2(%arg0: i32) -> (i32, i32, i32) {
    %c0_i32 = arith.constant 0 : i32
    %c0_i32_0 = arith.constant 0 : i32
    %c0_i32_1 = arith.constant 0 : i32
    %c0_i32_2 = arith.constant 0 : i32
    return %c0_i32, %c0_i32_0, %c0_i32_1 : i32, i32, i32
  }
  func.func @transform_3(%arg0: i32) -> (i32, i32, i32) {
    %c0_i32 = arith.constant 0 : i32
    %c0_i32_0 = arith.constant 0 : i32
    %c0_i32_1 = arith.constant 0 : i32
    %c0_i32_2 = arith.constant 0 : i32
    return %c0_i32, %c0_i32_0, %c0_i32_1 : i32, i32, i32
  }
  func.func @transform_4(%arg0: i32) -> (i32, i32, i32) {
    %c0_i32 = arith.constant 0 : i32
    %c0_i32_0 = arith.constant 0 : i32
    %c0_i32_1 = arith.constant 0 : i32
    return %arg0, %c0_i32, %c0_i32_0 : i32, i32, i32
  }
  func.func @transform_5(%arg0: i32) -> (i32, i32, i32) {
    %c0_i32 = arith.constant 0 : i32
    %c0_i32_0 = arith.constant 0 : i32
    %c0_i32_1 = arith.constant 0 : i32
    return %arg0, %c0_i32, %c0_i32_0 : i32, i32, i32
  }
}

</mosaic_0001>

<bundles_post_ra>
// kernel: tpu_custom_call.1
= control target key start
LH: loop header
LB: loop body
LE: loop exit
PB: predicated region body
PF: predicated region fallthrough
CT: control target
= control target key end

     0   :  { %s1649_s0 = inlined_call_operand.hbm [shape: f32[2,8,128], index: 0, kind: input, shape index: {}]   ;;  %s1650_s1 = inlined_call_operand.hbm [shape: bf16[2,8,128], index: 1, kind: input, shape index: {}]   ;;  %s1651_s2 = inlined_call_operand.hbm [shape: f32[3,8,8], index: 2, kind: input, shape index: {}]   ;;  %s1652_s3 = inlined_call_operand.hbm [shape: f32[3,8,8], index: 3, kind: input, shape index: {}]   ;;  %s1653_s4 = inlined_call_operand.hbm [shape: bf16[2,8,128], index: 4, kind: output, shape index: {0}]   ;;  %s1654_s5 = inlined_call_operand.vmem [shape: f32[2,16,1], index: 5, kind: output, shape index: {1}]  }
   0x1   :  { %1659 = sst [smem:[#allocation16_spill]] %s1649_s0 }
   0x2   :  { %11 = vsyncpa [#allocation3], 0 }
   0x3   :  { %13 = vsyncpa [#allocation3 + $0x1], 0 }
   0x4   :  { %14 = vsyncpa [#allocation6], 0 }
   0x5   :  { %16 = vsyncpa [#allocation6 + $0x1], 0 }
   0x6   :  { %17 = vsyncpa [#allocation9], 0 }
   0x7   :  { %18 = vsyncpa [#allocation4], 0 }
   0x8   :  { %20 = vsyncpa [#allocation4 + $0x1], 0  ;;  %s1360_s18 = smov 0   ;;  %s1362_s19 = smov 0  }
   0x9   :  { %s1364_s20 = smov 0   ;;  %s1366_s21 = smov 0  }
   0xa LB: > { %s1381_s22 = sadd.s32 4294967295, %s1317_s21   ;;  %s956_s23 = sadd.s32 4294967294, %s1317_s21   ;;  %s1317_s21 = sphi %s1366_s21, %s1680_s21   ;;  %s1313_s20 = sphi %s1364_s20, %s1679_s20   ;;  %s1309_s19 = sphi %s1362_s19, %s1678_s19   ;;  %s1305_s18 = sphi %s1360_s18, %s1677_s18  }
   0xb   : > { %p46_p0 = scmp.ne.s32.totalorder %s1309_s19, %s1305_s18  ;;  %p1655_p1 = scmp.eq.s32.totalorder %s1381_s22, 0 }
   0xc   : > { %p144_p3 = scmp.eq.s32.totalorder %s956_s23, 1  ;;  %p957_p5 = scmp.ge.s32.totalorder %s1317_s21, 1 }
   0xd   : > { %p1390_p4 = por %p1655_p1, %p46_p0  ;;  %p177_p7 = scmp.lt.s32.totalorder %s1317_s21, 3 }
   0xe   : > { %p1395_p6 = por %p144_p3, %p46_p0  ;;  %s1319_s27 = smov [#allocation7]  }
   0xf   : > { %s1660_s24 = scalar_select %p1390_p4, 1, 0 }
  0x10   : > { %s1661_s25 = scalar_select %p1395_p6, 1, 0 }
  0x11   : > { %p1400_p8 = pnand %p957_p5, %p177_p7  ;;  %s189_s28 = sshll.u32 %s1319_s27, 4  ;;  %s1404_s28 = int_to_ptr.vmem [resolvable:$true] %s189_s28 }
  0x12   : > { %s1320_s30 = smov [#allocation8]   ;;  %s1123_s9 = scalar_lea.hbm %s1651_s2, 384 }
  0x13   : > { %s1662_s26 = scalar_select %p1400_p8, 1, 0 }
  0x14   : > { %p1059_p9 = pneg %p1400_p8  ;;  %s202_s6 = sshll.u32 %s1320_s30, 4  ;;  %s1415_s6 = int_to_ptr.vmem [resolvable:$true] %s202_s6 }
  0x15   : > { %p1124_p12 = scmp.ne.s32.totalorder %s1651_s2, %s1123_s9  ;;  %p1130_p5 = scmp.lt.u32.totalorder %s1123_s9, %s1651_s2 }
  0x16   : > { %p1411_p11 = pnand %p1059_p9, %p1655_p1 }
  0x18   : > { %p1125_p13 = pneg %p1411_p11 }
  0x1a   : > { %p1126_p0 = pnand %p1125_p13, %p1124_p12 }
  0x1c   : > { %p1127_p3 = pneg %p1126_p0 }
  0x1e   : > { %p1132_p7 = pnand %p1130_p5, %p1127_p3 }
  0x20   : > { %1135 = shalt.err (!%p1132_p7)
}
  0x21   : > { %s1136_s14 = scalar_lea.vmem %s1404_s28, 384  ;;  %p1144_p2 = scmp.lt.s32.totalorder %s1404_s28, %s1404_s28 }
  0x22   : > { %p1137_p9 = scmp.ne.s32.totalorder %s1404_s28, %s1136_s14  ;;  %p1145_p12 = scmp.lt.s32.totalorder %s1136_s14, %s1136_s14 }
  0x24   : > { %p1139_p10 = pnand %p1137_p9, %p1125_p13  ;;  %p1146_p0 = por %p1145_p12, %p1144_p2 }
  0x26   : > { %p1140_p1 = pneg %p1139_p10 }
  0x28   : > { %p1147_p6 = pnand %p1146_p0, %p1140_p1 }
  0x2a   : > { %1150 = shalt.err (!%p1147_p6)
}
  0x2b   : > { %s1321_s15 = smov 128   ;;  %s1322_s16 = smov 8  }
  0x2c   : > { %1062 = dma.hbm_to_vmem [thread:$0]  (!%p1411_p11), %s1651_s2, 384, %s1404_s28, [#allocation6], %s1321_s15, %s1321_s15, %s1322_s16  }
  0x2d   : > { %s1151_s7 = scalar_lea.hbm %s1652_s3, 384 }
  0x2e   : > { %p1152_p2 = scmp.ne.s32.totalorder %s1652_s3, %s1151_s7  ;;  %p1158_p10 = scmp.lt.u32.totalorder %s1151_s7, %s1652_s3 }
  0x30   : > { %p1154_p1 = pnand %p1152_p2, %p1125_p13 }
  0x32   : > { %p1155_p6 = pneg %p1154_p1 }
  0x34   : > { %p1160_p3 = pnand %p1158_p10, %p1155_p6 }
  0x36   : > { %1163 = shalt.err (!%p1160_p3)
}
  0x37   : > { %s1164_s28 = scalar_lea.vmem %s1415_s6, 384  ;;  %p1172_p12 = scmp.lt.s32.totalorder %s1415_s6, %s1415_s6 }
  0x38   : > { %p1165_p5 = scmp.ne.s32.totalorder %s1415_s6, %s1164_s28  ;;  %p1173_p0 = scmp.lt.s32.totalorder %s1164_s28, %s1164_s28 }
  0x3a   : > { %p1167_p7 = pnand %p1165_p5, %p1125_p13  ;;  %p1174_p2 = por %p1173_p0, %p1172_p12 }
  0x3c   : > { %p1168_p9 = pneg %p1167_p7 }
  0x3e   : > { %p1175_p1 = pnand %p1174_p2, %p1168_p9 }
  0x40   : > { %1178 = shalt.err (!%p1175_p1)
}
  0x41   : > { %1065 = dma.hbm_to_vmem [thread:$0]  (!%p1411_p11), %s1652_s3, 384, %s1415_s6, [#allocation9], %s1321_s15, %s1321_s15, %s1322_s16  }
  0x42   : > { %s1470_s14 = sadd.s32 1, %s1317_s21   ;;  %s33_s29 = sadd.s32 1, %s1313_s20 }
  0x43   : > { %s30_s17 = ssub.s32 %s1317_s21, %s1470_s14  ;;  %p40_p13 = scmp.ne.s32.totalorder %s1313_s20, %s1309_s19 }
  0x44   : > { %p31_p6 = scmp.eq.s32.totalorder %s30_s17, 0  ;;  %p41_p10 = scmp.eq.s32.totalorder %s1317_s21, 0 }
  0x45   : > { %p1664_p3 = scmp.eq.s32.totalorder %s1381_s22, 1  ;;  %p1079_p7 = scmp.lt.s32.totalorder %s1317_s21, 2 }
  0x46   : > { %s1486_s27 = scalar_select %p31_p6, %s1313_s20, %s33_s29  }
  0x47   : > { %p1480_p5 = por %p1664_p3, %p40_p13  ;;  %p42_p9 = por %p41_p10, %p40_p13 }
  0x48   : > { %s1489_s30 = sand.u32 1, %s1313_s20   ;;  %s962_s15 = sshll.u32 %s1317_s21, 7 }
  0x49   : > { %s1665_s23 = scalar_select %p1480_p5, 1, 0 }
  0x4a   : > { %s961_s6 = sshll.u32 %s1489_s30, 3  ;;  %s1666_s0 = sld [smem:[#allocation16_spill]] }
  0x4b   : > { %s220_s9 = scalar_lea.vmem [#allocation2], %s961_s6  ;;  %p1500_p11 = pnand %p1079_p7, %p42_p9 }
  0x4c   : > { %s227_s10 = sshll.u32 %s220_s9, 4  ;;  %s234_s28 = sand.u32 1, %s1317_s21   ;;  %s1498_s10 = int_to_ptr.vmem [resolvable:$true] %s227_s10 }
  0x4d   : > { %s963_s12 = sshll.u32 %s1489_s30, 2  ;;  %s217_s13 = scalar_lea.sflag [#allocation3], %s1489_s30 }
  0x4e   : > { %p1181_p0 = pneg %p1500_p11 }
  0x50   : > { %s1496_s8 = scalar_lea.hbm %s1666_s0, %s962_s15  ;;  %s1184_s15 = scalar_lea.hbm %s1666_s0, 256 }
  0x51   : > { %s1179_s29 = scalar_lea.hbm %s1496_s8, 128  ;;  %p1185_p13 = scmp.lt.u32.totalorder %s1496_s8, %s1666_s0 }
  0x52   : > { %p1180_p12 = scmp.ne.s32.totalorder %s1496_s8, %s1179_s29  ;;  %p1186_p6 = scmp.lt.u32.totalorder %s1184_s15, %s1179_s29 }
  0x53   : > { %p1188_p3 = scmp.lt.u32.totalorder %s1179_s29, %s1496_s8 }
  0x54   : > { %p1182_p2 = pnand %p1181_p0, %p1180_p12  ;;  %p1187_p10 = por %p1186_p6, %p1185_p13 }
  0x56   : > { %p1183_p1 = pneg %p1182_p2  ;;  %p1189_p7 = por %p1188_p3, %p1187_p10 }
  0x58   : > { %p1190_p9 = pnand %p1189_p7, %p1183_p1 }
  0x5a   : > { %1193 = shalt.err (!%p1190_p9)
}
  0x5b   : > { %s1194_s9 = scalar_lea.vmem %s1498_s10, 128  ;;  %s1323_s17 = smov [#allocation2]  }
  0x5c   : > { %p1195_p12 = scmp.ne.s32.totalorder %s1498_s10, %s1194_s9  ;;  %s1199_s6 = sshll.u32 %s1323_s17, 4  ;;  %s1200_s6 = int_to_ptr.vmem [resolvable:$false] %s1199_s6 }
  0x5d   : > { %s1201_s16 = scalar_lea.vmem %s1200_s6, 256  ;;  %p1202_p4 = scmp.lt.s32.totalorder %s1498_s10, %s1200_s6 }
  0x5e   : > { %p1197_p2 = pnand %p1195_p12, %p1181_p0  ;;  %p1203_p13 = scmp.lt.s32.totalorder %s1201_s16, %s1194_s9 }
  0x60   : > { %p1198_p5 = pneg %p1197_p2  ;;  %p1204_p6 = por %p1203_p13, %p1202_p4 }
  0x62   : > { %p1205_p10 = pnand %p1204_p6, %p1198_p5 }
  0x64   : > { %1208 = shalt.err (!%p1205_p10)
}
  0x65   : > { %1069 = dma.hbm_to_vmem [thread:$0]  (!%p1500_p11), %s1496_s8, 128, %s1498_s10, %s217_s13  }
  0x66   : > { %s964_s29 = sshll.u32 %s1317_s21, 6  ;;  %s238_s9 = scalar_lea.vmem [#allocation5], %s963_s12 }
  0x67   : > { %s1536_s17 = scalar_lea.hbm %s1650_s1, %s964_s29  ;;  %s245_s6 = sshll.u32 %s238_s9, 4  ;;  %s246_s6 = int_to_ptr.vmem [resolvable:$true] %s245_s6 }
  0x68   : > { %s235_s16 = scalar_lea.sflag [#allocation6], %s234_s28  ;;  %s1209_s0 = scalar_lea.hbm %s1536_s17, 64 }
  0x69   : > { %p1210_p4 = scmp.ne.s32.totalorder %s1536_s17, %s1209_s0  ;;  %s1214_s13 = scalar_lea.hbm %s1650_s1, 128 }
  0x6a   : > { %p1215_p3 = scmp.lt.u32.totalorder %s1536_s17, %s1650_s1  ;;  %p1216_p7 = scmp.lt.u32.totalorder %s1214_s13, %s1209_s0 }
  0x6b   : > { %p1212_p5 = pnand %p1210_p4, %p1181_p0  ;;  %p1218_p12 = scmp.lt.u32.totalorder %s1209_s0, %s1536_s17 }
  0x6c   : > { %p1217_p9 = por %p1216_p7, %p1215_p3 }
  0x6d   : > { %p1213_p1 = pneg %p1212_p5 }
  0x6e   : > { %p1219_p2 = por %p1218_p12, %p1217_p9 }
  0x70   : > { %p1220_p13 = pnand %p1219_p2, %p1213_p1 }
  0x72   : > { %1223 = shalt.err (!%p1220_p13)
}
  0x73   : > { %s1224_s28 = scalar_lea.vmem %s246_s6, 64  ;;  %s1324_s12 = smov [#allocation5]  }
  0x74   : > { %p1225_p6 = scmp.ne.s32.totalorder %s246_s6, %s1224_s28  ;;  %s1229_s15 = sshll.u32 %s1324_s12, 4  ;;  %s1230_s15 = int_to_ptr.vmem [resolvable:$false] %s1229_s15 }
  0x75   : > { %s1231_s7 = scalar_lea.vmem %s1230_s15, 128  ;;  %p1232_p5 = scmp.lt.s32.totalorder %s246_s6, %s1230_s15 }
  0x76   : > { %p1227_p10 = pnand %p1225_p6, %p1181_p0  ;;  %p1233_p8 = scmp.lt.s32.totalorder %s1231_s7, %s1224_s28 }
  0x78   : > { %p1228_p4 = pneg %p1227_p10  ;;  %p1234_p3 = por %p1233_p8, %p1232_p5 }
  0x7a   : > { %p1235_p7 = pnand %p1234_p3, %p1228_p4 }
  0x7c   : > { %1238 = shalt.err (!%p1235_p7)
}
  0x7d   : > { %1072 = dma.hbm_to_vmem [thread:$0]  (!%p1500_p11), %s1536_s17, 64, %s246_s6, %s235_s16  }
  0x7e   : > { %p1668_p1 = scmp.ne.s32.totalorder %s1662_s26, 0 }
  0x7f   : > { %s1564_s0 = sand.u32 (!%p1668_p1), 1, %s1309_s19   ;;  %p1669_p0 = scmp.ne.s32.totalorder (!%p1668_p1), %s1660_s24, 0 }
  0x80   : > { %254 = sbr.rel (%p1668_p1) target bundleno = 641 (0x281), region = 36  ;;  %s966_s9 = sshll.u32 (!%p1668_p1), %s1564_s0, 3 }
  0x81   : > { %s257_s8 = scalar_lea.sflag (!%p1668_p1), [#allocation3], %s1564_s0  ;;  %s260_s10 = scalar_lea.vmem (!%p1668_p1), [#allocation2], %s966_s9 }
  0x87   : > { %1284 = dma.done.wait (%p1669_p0), %s257_s8, 128  }
  0x88   : > { %1286 = vsyncadd (%p1669_p0), %s257_s8, 4294967168  ;;  %s265_s26 = sand.u32 1, %s1381_s22   ;;  %s967_s11 = sshll.u32 %s1564_s0, 2 }
  0x89   : > { %s266_s17 = scalar_lea.sflag [#allocation6], %s265_s26  ;;  %s269_s6 = scalar_lea.vmem [#allocation5], %s967_s11 }
  0x8a   : > { %1288 = dma.done.wait (%p1669_p0), %s266_s17, 64  }
  0x8b   : > { %1290 = vsyncadd (%p1669_p0), %s266_s17, 4294967232  ;;  %p1670_p8 = scmp.eq.s32.totalorder %s1381_s22, 0 }
  0x8d   : > { %1292 = dma.done.wait (%p1670_p8), [#allocation6], 384   ;;  %p1671_p11 = pmov %p1670_p8 }
  0x8e   : > { %p1672_p9 = pmov %p1670_p8 }
  0x8f   : > { %1294 = vsyncadd (%p1671_p11), [#allocation6], 4294966912 }
  0x90   : > { %1296 = dma.done.wait (%p1672_p9), [#allocation9], 384   ;;  %p1673_p12 = pmov %p1670_p8 }
  0x91   : > { %v1325_v0 = vmov 0.0   ;;  %vm1326_vm0 = vmmov 0   ;;  %vm338_vm1 = vcmask 64512   ;;  %v320_v1 = vld [vmem:[%s269_s6] sm:$0xf]  ;;  %v319_v2 = vld [vmem:[%s260_s10] sm:$0xff]  ;;  %v328_v5 = vlaneseq }
  0x92   : > { %1298 = vsyncadd (%p1673_p12), [#allocation9], 4294966912  ;;  %1006 = vmatprep.subr.mxu1 %v1325_v0  ;;  %1008 = vmatprep.mubr.msk.f32.mxu1 %vm1326_vm0, %v1325_v0  ;;  %v323_v3 = vld [vmem:[#allocation7 + $0x8] sm:$0xff]  ;;  %v321_v4 = vunpack.c.l.bf16 %v320_v1  ;;  %s1327_s24 = smov 127   ;;  %s1328_s16 = smov 1   ;;  %v325_v7 = vld [vmem:[#allocation8] sm:$0xff] }
  0x93   : > { %1021 = vmatprep.subr.mxu0 %v1325_v0  ;;  %1023 = vmatprep.mubr.msk.f32.mxu0 %vm1326_vm0, %v1325_v0  ;;  %v329_v6 = vand.u32 127, %v328_v5  ;;  %v322_v10 = vld [vmem:[#allocation7] sm:$0xff]  ;;  %v324_v14 = vld [vmem:[#allocation7 + $0x10] sm:$0xff]  ;;  %v327_v15 = vld [vmem:[#allocation8 + $0x10] sm:$0xff]  ;;  %s306_s13 = scalar_lea.vmem [#allocation10], %s967_s11  ;;  %s988_s30 = sshll.u32 %s1381_s22, 6 }
  0x94   : > { %335 = vrot.lane.b32.xlu1 %v319_v2, %s1327_s24  ;;  %1007 = vmatpush3.msra.mxu1 %v319_v2  ;;  %v326_v12 = vld [vmem:[#allocation8 + $0x8] sm:$0xff]  ;;  %s816_s29 = sshll.u32 %s306_s13, 4  ;;  %s1606_s15 = scalar_lea.hbm %s1653_s4, %s988_s30  ;;  %s817_s29 = int_to_ptr.vmem [resolvable:$true] %s816_s29 }
  0x95   : > { %1009 = vmatmul.mubr.msk.f32.vlgmr.msra.gmra.mrb[0].mxu1 %vm338_vm1, %v323_v3  ;;  %1011 = vmatprep.subr.mxu1 %v1325_v0  ;;  %vm992_vm2 = vcmp.ne.s32.totalorder %v329_v6, 0  ;;  %vm993_vm3 = vcmp.ne.s32.totalorder %v329_v6, 127  ;;  %s798_s7 = scalar_lea.sflag [#allocation4], %s1564_s0  ;;  %s1239_s9 = scalar_lea.vmem %s817_s29, 64 }
  0x96   : > { %559 = vrot.lane.b32.xlu0 %v321_v4, %s1328_s16  ;;  %1013 = vmatprep.mubr.msk.f32.mxu1 %vm1326_vm0, %v1325_v0  ;;  %p1240_p2 = scmp.ne.s32.totalorder %s817_s29, %s1239_s9  ;;  %p1674_p13 = scmp.ne.s32.totalorder %s1665_s23, 0 }
  0x97   : > { %s1329_s8 = smov [#allocation10]  }
  0x98   : > { %562 = vrot.lane.b32.xlu1 %v321_v4, %s1327_s24  ;;  %p1241_p6 = pnand %p1240_p2, %p1674_p13  ;;  %s1243_s10 = sshll.u32 %s1329_s8, 4  ;;  %s1244_s10 = int_to_ptr.vmem [resolvable:$false] %s1243_s10 }
  0x99   : > { %s1245_s26 = scalar_lea.vmem %s1244_s10, 128  ;;  %p1246_p4 = scmp.lt.s32.totalorder %s817_s29, %s1244_s10 }
  0x9a   : > { %331 = vrot.lane.b32.xlu0 %v319_v2, %s1328_s16  ;;  %p1242_p10 = pneg %p1241_p6  ;;  %p1247_p5 = scmp.lt.s32.totalorder %s1245_s26, %s1239_s9 }
  0x9c   : > { %p1248_p3 = por %p1247_p5, %p1246_p4 }
  0x9e   : > { %p1249_p7 = pnand %p1248_p3, %p1242_p10 }
 0x106   : > { %v336_v9 = vpop.permute.xlu1 %335 }
 0x108   : > { %v560_v8 = vpop.permute.xlu0 %559 }
 0x109   : > { %1022 = vmatpush3.msk.msra.mxu0 %vm992_vm2, %v560_v8 }
 0x10a   : > { %1024 = vmatmul.mubr.msk.f32.vlgmr.msra.gmra.mrb[0].mxu0 %vm338_vm1, %v325_v7  ;;  %1026 = vmatprep.subr.mxu0 %v1325_v0  ;;  %v563_v13 = vpop.permute.xlu1 %562 }
 0x10b   : > { %1027 = vmatpush3.msra.mxu0 %v321_v4  ;;  %1028 = vmatprep.mubr.msk.f32.mxu0 %vm1326_vm0, %v1325_v0 }
 0x10c   : > { %v332_v11 = vpop.permute.xlu0 %331  ;;  %1031 = vmatprep.subr.mxu0 %v1325_v0 }
 0x10d   : > { %1012 = vmatpush3.msk.msra.mxu1 %vm992_vm2, %v332_v11 }
 0x10e   : > { %1014 = vmatmul.mubr.msk.f32.vlgmr.msra.gmra.mrb[0].mxu1 %vm338_vm1, %v322_v10  ;;  %1016 = vmatprep.subr.mxu1 %v1325_v0 }
 0x10f   : > { %1017 = vmatpush3.msk.msra.mxu1 %vm993_vm3, %v336_v9  ;;  %1018 = vmatprep.mubr.msk.f32.mxu1 %vm1326_vm0, %v1325_v0 }
 0x112   : > { %1029 = vmatmul.mubr.msk.f32.vlgmr.msra.gmra.mrb[0].mxu0 %vm338_vm1, %v326_v12 }
 0x113   : > { %1032 = vmatpush3.msk.msra.mxu0 %vm993_vm3, %v563_v13  ;;  %1033 = vmatprep.mubr.msk.f32.mxu0 %vm1326_vm0, %v1325_v0 }
 0x116   : > { %1019 = vmatmul.mubr.msk.f32.vlgmr.msra.gmra.mrb[0].mxu1 %vm338_vm1, %v324_v14 }
 0x11a   : > { %1034 = vmatmul.mubr.msk.f32.vlgmr.msra.gmra.mrb[0].mxu0 %vm338_vm1, %v327_v15 }
 0x1e9   : > { %v554_v16 = vpop.f32.mrb[0].mxu1 }
 0x1ea   : > { %v1020_v17 = vpop.f32.mrb[1].mxu1 }
 0x1ed   : > { %v782_v18 = vpop.f32.mrb[0].mxu0 }
 0x1ee   : > { %v1036_v19 = vadd.f32 %v782_v18, %v554_v16  ;;  %v1035_v20 = vpop.f32.mrb[1].mxu0 }
 0x1f0   : > { %v787_v21 = vpack.c.bf16 %v1036_v19, %v1036_v19  ;;  %789 = vadd.xlane.f32.xlu0 %v1036_v19  ;;  %v791_v22 = vmul.f32 %v1036_v19, %v1036_v19 }
 0x1f2   : > { %792 = vadd.xlane.f32.xlu1 %v791_v22  ;;  %788 = vst [vmem:[%s306_s13] sm:$0xf] %v787_v21 }
 0x1f3   : > { %1252 = shalt.err (!%p1249_p7)
}
 0x1f4   : > { %s1253_s0 = scalar_lea.hbm %s1606_s15, 64  ;;  %s1257_s6 = scalar_lea.hbm %s1653_s4, 128 }
 0x1f5   : > { %p1254_p1 = scmp.ne.s32.totalorder %s1606_s15, %s1253_s0  ;;  %p1258_p11 = scmp.lt.u32.totalorder %s1606_s15, %s1653_s4 }
 0x1f6   : > { %p1259_p9 = scmp.lt.u32.totalorder %s1257_s6, %s1253_s0  ;;  %p1261_p2 = scmp.lt.u32.totalorder %s1253_s0, %s1606_s15 }
 0x1f7   : > { %p1255_p0 = pnand %p1254_p1, %p1674_p13 }
 0x1f8   : > { %p1260_p12 = por %p1259_p9, %p1258_p11 }
 0x1f9   : > { %p1256_p8 = pneg %p1255_p0 }
 0x1fa   : > { %p1262_p6 = por %p1261_p2, %p1260_p12 }
 0x1fc   : > { %p1263_p10 = pnand %p1262_p6, %p1256_p8 }
 0x1fe   : > { %1266 = shalt.err (!%p1263_p10)
}
 0x1ff   : > { %1057 = dma.vmem_to_hbm [thread:$0]  (%p1674_p13), %s817_s29, 64, %s1606_s15, %s798_s7   ;;  %vm794_vm4 = vcmask 7168  }
 0x200   : > { %p314_p4 = scmp.lt.s32.totalorder %s1381_s22, 1 }
 0x202   : > { %s1682_s22 = smov (!%p314_p4, %s1381_s22), 1 }
 0x203   : > { %s991_s13 = sshll.u32 %s1682_s22, 4 }
 0x204   : > { %s318_s12 = scalar_lea.vmem %s1654_s5, %s991_s13 }
 0x27d   : > { %v790_v23 = vpop.xlane.xlu0 %789 }
 0x27e   : > { %795 = vst.msk [vmem:[%s318_s12] sm:$0xff] %vm794_vm4, %v790_v23 }
 0x27f   : > { %v793_v24 = vpop.xlane.xlu1 %792 }
 0x280   : > { %796 = vst.msk [vmem:[%s318_s12 + $0x8] sm:$0xff] %vm794_vm4, %v793_v24 }
 0x281 PF: > { %s831_s23 = sand.u32 1, %s1305_s18   ;;  %p1675_p5 = scmp.ne.s32.totalorder %s1661_s25, 0 }
 0x282   : > { %p1676_p3 = scmp.ge.s32.totalorder %s1317_s21, 2  ;;  %s832_s29 = scalar_lea.sflag [#allocation4], %s831_s23 }
 0x284   : > { %p1074_p13 = pnand %p1676_p3, %p1675_p5 }
 0x286   : > { %1300 = dma.done.wait (!%p1074_p13), %s832_s29, 64  }
 0x287   : > { %1302 = vsyncadd (!%p1074_p13), %s832_s29, 4294967232  ;;  %p23_p7 = scmp.ge.s32.totalorder %s1470_s14, 4   ;;  %s1677_s18 = smov %s1309_s19 }
 0x288   : > { %s1678_s19 = smov %s1313_s20  ;;  %s1679_s20 = smov %s1486_s27 }
 0x289   : > { %s1680_s21 = smov %s1470_s14  ;;  %25 = sbr.rel (!%p23_p7) target bundleno = 10 (0xa), region = 114 }
 0x290   :  { %845 = vsyncpa [#allocation3], 1 }
 0x291   :  { %847 = vsyncpa [#allocation3 + $0x1], 1 }
 0x292   :  { %848 = vsyncpa [#allocation6], 1 }
 0x293   :  { %850 = vsyncpa [#allocation6 + $0x1], 1 }
 0x294   :  { %851 = vsyncpa [#allocation9], 1 }
 0x295   :  { %852 = vsyncpa [#allocation4], 1 }
 0x296   :  { %854 = vsyncpa [#allocation4 + $0x1], 1 }

</bundles_post_ra>
